<compile_context>
chip_gen: v7x
topology: tpu7x:2x2x1
jax: 0.10.0
libtpu: 0.0.40
codegen_flags: <defaults>
</compile_context>

<pallas_src>
import functools

import numpy as np

import jax
import jax.numpy as jnp
from jax.experimental import pallas as pl
from jax.experimental.pallas import tpu as pltpu


def _shortcut_kernel(x_ref, sel_ref, o_ref, *, pad_before):
    # x_ref:   (1, C, H*W)        one image, spatial dims flattened (lane-dense)
    # sel_ref: (H*W, Ho*Wo)       constant 0/1 stride-2 selection matrix
    # o_ref:   (1, C + 2*pad, Ho*Wo)
    x = x_ref[0]                                        # (C, H*W)
    y = jnp.dot(x, sel_ref[...],
                preferred_element_type=jnp.float32)     # (C, Ho*Wo)
    y = y.astype(o_ref.dtype)

    if pad_before > 0:
        zeros = jnp.zeros((pad_before, y.shape[1]), o_ref.dtype)
        tile = jnp.concatenate([zeros, y, zeros], axis=0)   # (C_out, Ho*Wo)
    else:
        tile = y

    o_ref[0] = tile                                     # single full-block store


def lambda_layer(x, planes=None):
    """ResNet20 option-A shortcut: x[:, :, ::2, ::2] zero-padded on channels.

    x: (N, C, H, W)  ->  (N, C + 2*(planes//4), ceil(H/2), ceil(W/2))
    """
    n, c, h, w = x.shape
    if planes is None:
        planes = 2 * c                       # standard ResNet20 usage
    pad = planes // 4
    ho, wo = (h + 1) // 2, (w + 1) // 2
    c_out = c + 2 * pad
    hw, howo = h * w, ho * wo

    # Free (bitcast-level) reshape only -- no transpose, no data movement.
    x_flat = x.reshape(n, c, hw)

    # Compile-time constant selection matrix: sel[p, q] = 1 iff flat input
    # position p corresponds to output position q of the ::2,::2 subsample.
    q = np.arange(howo)
    src = 2 * (q // wo) * w + 2 * (q % wo)
    sel_np = np.zeros((hw, howo), dtype=np.float32)
    sel_np[src, q] = 1.0
    sel = jnp.asarray(sel_np, dtype=x.dtype)

    kernel = functools.partial(_shortcut_kernel, pad_before=pad)

    out_flat = pl.pallas_call(
        kernel,
        out_shape=jax.ShapeDtypeStruct((n, c_out, howo), x.dtype),
        grid_spec=pltpu.PrefetchScalarGridSpec(
            num_scalar_prefetch=0,
            grid=(n,),
            in_specs=[
                # Whole (C, H*W) image per step; lane dim = H*W (>=128).
                pl.BlockSpec((1, c, hw), lambda i: (i, 0, 0)),
                # Constant block index -> DMA'd once, stays resident in VMEM.
                pl.BlockSpec((hw, howo), lambda i: (0, 0)),
            ],
            out_specs=pl.BlockSpec((1, c_out, howo), lambda i: (i, 0, 0)),
        ),
        compiler_params=pltpu.CompilerParams(
            dimension_semantics=("parallel",)),
    )(x_flat, sel)

    # Free reshape back to NCHW spatial layout.
    return out_flat.reshape(n, c_out, ho, wo)


if __name__ == "__main__":
    key = jax.random.PRNGKey(0)

    # Small shapes consistent with the module usage: N=2, C=4, 16x16.
    x = jax.random.normal(key, (2, 4, 16, 16), dtype=jnp.float32)
    out = lambda_layer(x)                    # planes defaults to 2*C=8, pad=2
    out = jax.block_until_ready(out)

    pad = (2 * 4) // 4
    ref = jnp.pad(x[:, :, ::2, ::2],
                  ((0, 0), (pad, pad), (0, 0), (0, 0)),
                  mode="constant", constant_values=0.0)
    assert out.shape == (2, 8, 8, 8), out.shape
    assert out.dtype == x.dtype
    assert jnp.allclose(out, ref, atol=1e-6, rtol=1e-6), "mismatch vs reference"

    # Second check at the real ResNet20 first-shortcut shape (C=16, 32x32,
    # planes=32) to exercise the lane-dense (H*W=1024, Ho*Wo=256) path.
    key2 = jax.random.PRNGKey(0)
    x2 = jax.random.normal(key2, (2, 16, 32, 32), dtype=jnp.float32)
    out2 = jax.block_until_ready(lambda_layer(x2, planes=32))
    ref2 = jnp.pad(x2[:, :, ::2, ::2],
                   ((0, 0), (8, 8), (0, 0), (0, 0)),
                   mode="constant", constant_values=0.0)
    assert out2.shape == (2, 32, 16, 16), out2.shape
    assert jnp.allclose(out2, ref2, atol=1e-6, rtol=1e-6), "mismatch (32x32)"

    print("KERNEL_OK")
</pallas_src>

<mosaic_0001>
module attributes {stable_mosaic.version = 11 : i64} {
  func.func @_shortcut_kernel(%arg0: i32, %arg1: memref<1x4x256xf32, #tpu.memory_space<vmem>>, %arg2: memref<256x64xf32, #tpu.memory_space<vmem>>, %arg3: memref<1x8x64xf32, #tpu.memory_space<vmem>>) attributes {dimension_semantics = [#tpu.dimension_semantics<parallel>], iteration_bounds = array<i64: 2>, scalar_prefetch = 0 : i64, scratch_operands = 0 : i64, tpu.core_type = #tpu.core_type<tc>, window_params = [{transform_indices = @transform_0, window_bounds = array<i64: 1, 4, 256>}, {pipeline_mode = #tpu.pipeline_mode<synchronous>, transform_indices = @transform_1, window_bounds = array<i64: 256, 64>}, {transform_indices = @transform_2, window_bounds = array<i64: 1, 8, 64>}]} {
    %c0 = arith.constant 0 : index
    %c0_0 = arith.constant 0 : index
    %c0_1 = arith.constant 0 : index
    %0 = vector.load %arg1[%c0, %c0_0, %c0_1] : memref<1x4x256xf32, #tpu.memory_space<vmem>>, vector<1x4x256xf32>
    %1 = vector.shape_cast %0 : vector<1x4x256xf32> to vector<4x256xf32>
    %c0_2 = arith.constant 0 : index
    %c0_3 = arith.constant 0 : index
    %2 = vector.load %arg2[%c0_2, %c0_3] : memref<256x64xf32, #tpu.memory_space<vmem>>, vector<256x64xf32>
    %cst = arith.constant dense<0.000000e+00> : vector<4x64xf32>
    %3 = tpu.matmul %1, %2, %cst {dimension_numbers = #tpu.dot_dimension_numbers<[1], [0], [0], [1], [0, 0, 1, 1], [], []>} : vector<4x256xf32>, vector<256x64xf32>, vector<4x64xf32> -> vector<4x64xf32>
    %cst_4 = arith.constant 0.000000e+00 : f32
    %4 = vector.broadcast %cst_4 : f32 to vector<2x64xf32>
    %5 = tpu.concatenate %4, %3, %4 in 0 : vector<2x64xf32>, vector<4x64xf32>, vector<2x64xf32> -> vector<8x64xf32>
    %c0_5 = arith.constant 0 : index
    %c0_6 = arith.constant 0 : index
    %c0_7 = arith.constant 0 : index
    %6 = vector.load %arg3[%c0_5, %c0_6, %c0_7] : memref<1x8x64xf32, #tpu.memory_space<vmem>>, vector<1x8x64xf32>
    %7 = vector.shape_cast %6 : vector<1x8x64xf32> to vector<8x64xf32>
    %8 = vector.shape_cast %5 : vector<8x64xf32> to vector<1x8x64xf32>
    tpu.vector_store %arg3[%c0_5, %c0_6, %c0_7], %8 {strides = array<i32>} : memref<1x8x64xf32, #tpu.memory_space<vmem>>, vector<1x8x64xf32>,
    return
  }
  func.func @transform_0(%arg0: i32) -> (i32, i32, i32) {
    %c0_i32 = arith.constant 0 : i32
    %c0_i32_0 = arith.constant 0 : i32
    %c0_i32_1 = arith.constant 0 : i32
    return %arg0, %c0_i32, %c0_i32_0 : i32, i32, i32
  }
  func.func @transform_1(%arg0: i32) -> (i32, i32) {
    %c0_i32 = arith.constant 0 : i32
    %c0_i32_0 = arith.constant 0 : i32
    %c0_i32_1 = arith.constant 0 : i32
    return %c0_i32, %c0_i32_0 : i32, i32
  }
  func.func @transform_2(%arg0: i32) -> (i32, i32, i32) {
    %c0_i32 = arith.constant 0 : i32
    %c0_i32_0 = arith.constant 0 : i32
    %c0_i32_1 = arith.constant 0 : i32
    return %arg0, %c0_i32, %c0_i32_0 : i32, i32, i32
  }
}

</mosaic_0001>

<bundles_post_ra>
// kernel: tpu_custom_call.1
= control target key start
LH: loop header
LB: loop body
LE: loop exit
PB: predicated region body
PF: predicated region fallthrough
CT: control target
= control target key end

     0   :  { %7 = vsyncpa [#allocation3], 0  ;;  %s725_s0 = inlined_call_operand.vmem [shape: f32[2,4,256], index: 0, kind: input, shape index: {}]   ;;  %s726_s1 = inlined_call_operand.vmem [shape: f32[256,64], index: 1, kind: input, shape index: {}]   ;;  %s727_s2 = inlined_call_operand.hbm [shape: f32[2,8,64], index: 2, kind: output, shape index: {}]  }
   0x1   :  { %9 = vsyncpa [#allocation3 + $0x1], 0  ;;  %s529_s9 = smov 0   ;;  %s531_s10 = smov 0  }
   0x2   :  { %s533_s11 = smov 0   ;;  %s535_s12 = smov 0  }
   0x3 LB: > { %s550_s13 = sadd.s32 4294967295, %s511_s12   ;;  %s330_s14 = sadd.s32 4294967294, %s511_s12   ;;  %s511_s12 = sphi %s535_s12, %s733_s12   ;;  %s507_s11 = sphi %s533_s11, %s732_s11   ;;  %s503_s10 = sphi %s531_s10, %s731_s10   ;;  %s499_s9 = sphi %s529_s9, %s730_s9  }
   0x4   : > { %s554_s15 = sadd.s32 1, %s511_s12   ;;  %s69_s16 = sadd.s32 1, %s507_s11 }
   0x5   : > { %s66_s17 = ssub.s32 %s511_s12, %s554_s15  ;;  %p79_p0 = scmp.ne.s32.totalorder %s507_s11, %s503_s10 }
   0x6   : > { %p67_p1 = scmp.eq.s32.totalorder %s66_s17, 0  ;;  %p80_p2 = scmp.eq.s32.totalorder %s550_s13, 1 }
   0x7   : > { %p85_p3 = scmp.ne.s32.totalorder %s503_s10, %s499_s9  ;;  %p86_p4 = scmp.eq.s32.totalorder %s330_s14, 1 }
   0x8   : > { %s565_s18 = scalar_select %p67_p1, %s507_s11, %s69_s16  }
   0x9   : > { %p567_p5 = por %p80_p2, %p79_p0  ;;  %p571_p6 = por %p86_p4, %p85_p3 }
   0xa   : > { %p333_p7 = scmp.ge.s32.totalorder %s511_s12, 1  ;;  %p115_p8 = scmp.lt.s32.totalorder %s511_s12, 3 }
   0xc   : > { %p116_p9 = pnand %p333_p7, %p115_p8 }
   0xd   : > { %v159_v0 = vld [vmem:[%s726_s1 + $0x80] sm:$0xff] (!%p116_p9)  ;;  %v160_v1 = vld [vmem:[%s726_s1 + $0x88] sm:$0xff] (!%p116_p9)  ;;  %p137_p10 = scmp.lt.s32.totalorder (!%p116_p9), %s550_s13, 1  ;;  %v161_v5 = vld [vmem:[%s726_s1 + $0x90] sm:$0xff] (!%p116_p9)  ;;  %s134_s5 = sand.u32 (!%p116_p9), 1, %s503_s10   ;;  %vm251_vm0 = vcmask (!%p116_p9), 1041408  }
   0xe   : > { %119 = sbr.rel (%p116_p9) target bundleno = 281 (0x119), region = 28  ;;  %v143_v2 = vld [vmem:[%s726_s1] sm:$0xff] (!%p116_p9)  ;;  %v377_v3 = vpack.c.bf16 (!%p116_p9), %v160_v1, %v159_v0  ;;  %v144_v4 = vld [vmem:[%s726_s1 + $0x8] sm:$0xff] (!%p116_p9)  ;;  %v162_v6 = vld [vmem:[%s726_s1 + $0x98] sm:$0xff] (!%p116_p9)  ;;  %s338_s7 = sshll.u32 (!%p116_p9), %s550_s13, 7  ;;  %vm253_vm1 = vcmask (!%p116_p9), 1045504  }
   0xf   : > { %v379_v7 = vpack.c.bf16 (!%p116_p9), %v144_v4, %v143_v2  ;;  %v381_v8 = vpack.c.bf16 (!%p116_p9), %v162_v6, %v161_v5  ;;  %v145_v9 = vld [vmem:[%s726_s1 + $0x10] sm:$0xff] (!%p116_p9)  ;;  %v146_v10 = vld [vmem:[%s726_s1 + $0x18] sm:$0xff] (!%p116_p9)  ;;  %v163_v11 = vld [vmem:[%s726_s1 + $0xa0] sm:$0xff] (!%p116_p9)  ;;  %vm255_vm2 = vcmask (!%p116_p9), 523264   ;;  %s683_s21 = scalar_lea.hbm (!%p116_p9), %s727_s2, %s338_s7  ;;  %s258_s22 = scalar_lea.sflag (!%p116_p9), [#allocation3], %s134_s5 }
  0x10   : > { %378 = vmatprep.subr.bf16.mxu0 (!%p116_p9), %v377_v3  ;;  %v164_v12 = vld [vmem:[%s726_s1 + $0xa8] sm:$0xff] (!%p116_p9)  ;;  %v383_v13 = vpack.c.bf16 (!%p116_p9), %v146_v10, %v145_v9  ;;  %v147_v15 = vld [vmem:[%s726_s1 + $0x20] sm:$0xff] (!%p116_p9)  ;;  %v165_v17 = vld [vmem:[%s726_s1 + $0xb0] sm:$0xff] (!%p116_p9)  ;;  %s513_s24 = smov (!%p116_p9), [#allocation2]  }
  0x11   : > { %380 = vmatpush3.bf16.msra.mxu0 (!%p116_p9), %v379_v7  ;;  %v385_v14 = vpack.c.bf16 (!%p116_p9), %v164_v12, %v163_v11  ;;  %v148_v16 = vld [vmem:[%s726_s1 + $0x28] sm:$0xff] (!%p116_p9)  ;;  %v166_v18 = vld [vmem:[%s726_s1 + $0xb8] sm:$0xff] (!%p116_p9)  ;;  %v149_v21 = vld [vmem:[%s726_s1 + $0x30] sm:$0xff] (!%p116_p9) }
  0x12   : > { %382 = vmatprep.subr.bf16.mxu0 (!%p116_p9), %v381_v8  ;;  %v387_v19 = vpack.c.bf16 (!%p116_p9), %v148_v16, %v147_v15  ;;  %v389_v20 = vpack.c.bf16 (!%p116_p9), %v166_v18, %v165_v17  ;;  %v150_v22 = vld [vmem:[%s726_s1 + $0x38] sm:$0xff] (!%p116_p9)  ;;  %v167_v23 = vld [vmem:[%s726_s1 + $0xc0] sm:$0xff] (!%p116_p9)  ;;  %v168_v24 = vld [vmem:[%s726_s1 + $0xc8] sm:$0xff] (!%p116_p9) }
  0x13   : > { %v391_v27 = vpack.c.bf16 (!%p116_p9), %v150_v22, %v149_v21  ;;  %v393_v28 = vpack.c.bf16 (!%p116_p9), %v168_v24, %v167_v23  ;;  %v151_v29 = vld [vmem:[%s726_s1 + $0x40] sm:$0xff] (!%p116_p9)  ;;  %v152_v30 = vld [vmem:[%s726_s1 + $0x48] sm:$0xff] (!%p116_p9)  ;;  %v169_v31 = vld [vmem:[%s726_s1 + $0xd0] sm:$0xff] (!%p116_p9) }
  0x14   : > { %v170_v32 = vld [vmem:[%s726_s1 + $0xd8] sm:$0xff] (!%p116_p9)  ;;  %v395_v33 = vpack.c.bf16 (!%p116_p9), %v152_v30, %v151_v29  ;;  %v153_v35 = vld [vmem:[%s726_s1 + $0x50] sm:$0xff] (!%p116_p9)  ;;  %v171_v37 = vld [vmem:[%s726_s1 + $0xe0] sm:$0xff] (!%p116_p9) }
  0x15   : > { %s138_s17 = scalar_select %p137_p10, %s550_s13, 1  ;;  %384 = vmatpush3.bf16.msra.mxu0 %v383_v13  ;;  %v397_v34 = vpack.c.bf16 %v170_v32, %v169_v31  ;;  %v154_v36 = vld [vmem:[%s726_s1 + $0x58] sm:$0xff]  ;;  %v172_v38 = vld [vmem:[%s726_s1 + $0xe8] sm:$0xff]  ;;  %v155_v41 = vld [vmem:[%s726_s1 + $0x60] sm:$0xff] }
  0x16   : > { %386 = vmatprep.subr.bf16.mxu0 %v385_v14  ;;  %v399_v39 = vpack.c.bf16 %v154_v36, %v153_v35  ;;  %v401_v40 = vpack.c.bf16 %v172_v38, %v171_v37  ;;  %v156_v42 = vld [vmem:[%s726_s1 + $0x68] sm:$0xff]  ;;  %v173_v43 = vld [vmem:[%s726_s1 + $0xf0] sm:$0xff]  ;;  %v174_v44 = vld [vmem:[%s726_s1 + $0xf8] sm:$0xff] }
  0x17   : > { %s341_s23 = sshll.u32 %s138_s17, 3  ;;  %v403_v45 = vpack.c.bf16 %v156_v42, %v155_v41  ;;  %v405_v46 = vpack.c.bf16 %v174_v44, %v173_v43  ;;  %v157_v47 = vld [vmem:[%s726_s1 + $0x70] sm:$0xff]  ;;  %v158_v48 = vld [vmem:[%s726_s1 + $0x78] sm:$0xff] }
  0x18   : > { %s141_s6 = scalar_lea.vmem %s725_s0, %s341_s23  ;;  %v407_v49 = vpack.c.bf16 %v158_v48, %v157_v47  ;;  %s453_s23 = sshll.u32 %s513_s24, 4  ;;  %s454_s23 = int_to_ptr.vmem [resolvable:$false] %s453_s23 }
  0x19   : > { %v142_v25 = vld [vmem:[%s141_s6] sm:$0xff]  ;;  %388 = vmatpush3.bf16.msra.mxu0 %v387_v19  ;;  %s334_s6 = sshll.u32 %s134_s5, 3  ;;  %s455_s25 = scalar_lea.vmem %s454_s23, 256 }
  0x1a   : > { %v176_v26 = vcombine.high %v142_v25, %v142_v25  ;;  %390 = vmatprep.subr.bf16.mxu0 %v389_v20  ;;  %s136_s8 = scalar_lea.vmem [#allocation2], %s334_s6 }
  0x1b   : > { %s271_s14 = sshll.u32 %s136_s8, 4  ;;  %s685_s14 = int_to_ptr.vmem [resolvable:$true] %s271_s14 }
  0x1c   : > { %242 = vmatprep.mubr.f32.mxu0 %v176_v26  ;;  %s449_s13 = scalar_lea.vmem %s685_s14, 128  ;;  %p456_p0 = scmp.lt.s32.totalorder %s685_s14, %s454_s23 }
  0x1d   : > { %392 = vmatpush3.bf16.msra.mxu0 %v391_v27  ;;  %p450_p11 = scmp.ne.s32.totalorder %s685_s14, %s449_s13  ;;  %p457_p1 = scmp.lt.s32.totalorder %s455_s25, %s449_s13 }
  0x1e   : > { %394 = vmatprep.subr.bf16.mxu0 %v393_v28 }
  0x1f   : > { %p451_p12 = pnand %p450_p11, %p567_p5  ;;  %p458_p2 = por %p457_p1, %p456_p0 }
  0x21   : > { %396 = vmatpush3.bf16.msra.mxu0 %v395_v33  ;;  %p452_p13 = pneg %p451_p12 }
  0x22   : > { %398 = vmatprep.subr.bf16.mxu0 %v397_v34 }
  0x23   : > { %p459_p3 = pnand %p458_p2, %p452_p13 }
  0x25   : > { %400 = vmatpush3.bf16.msra.mxu0 %v399_v39 }
  0x26   : > { %402 = vmatprep.subr.bf16.mxu0 %v401_v40 }
  0x29   : > { %404 = vmatpush3.bf16.msra.mxu0 %v403_v45 }
  0x2a   : > { %406 = vmatprep.subr.bf16.mxu0 %v405_v46 }
  0x2d   : > { %408 = vmatpush3.bf16.msra.mxu0 %v407_v49 }
  0x30   : > { %243 = vmatmul.mubr.f32.vlgmr.msra.gmra.mrb[0].mxu0 %v142_v25 }
 0x103   : > { %v374_v50 = vpop.f32.mrb[0].mxu0 }
 0x104   : > { %v375_v51 = vpop.f32.mrb[1].mxu0 }
 0x105   : > { %v376_v52 = vadd.f32 %v375_v51, %v374_v50 }
 0x107   : > { %v249_v53 = vrot.slane %v376_v52, 6 }
 0x109   : > { %v252_v54 = vsel %vm251_vm0, 0.0, %v249_v53 }
 0x10a   : > { %v254_v55 = vsel %vm253_vm1, %v252_v54, 0.0 }
 0x10b   : > { %256 = vst.msk [vmem:[%s136_s8] sm:$0xff] %vm255_vm2, %v254_v55 }
 0x10c   : > { %462 = shalt.err (!%p459_p3)
}
 0x10d   : > { %s463_s26 = scalar_lea.hbm %s683_s21, 128  ;;  %s467_s29 = scalar_lea.hbm %s727_s2, 256 }
 0x10e   : > { %p464_p4 = scmp.ne.s32.totalorder %s683_s21, %s463_s26  ;;  %p468_p9 = scmp.lt.u32.totalorder %s683_s21, %s727_s2 }
 0x10f   : > { %p469_p10 = scmp.lt.u32.totalorder %s467_s29, %s463_s26  ;;  %p471_p12 = scmp.lt.u32.totalorder %s463_s26, %s683_s21 }
 0x110   : > { %p465_p7 = pnand %p464_p4, %p567_p5 }
 0x111   : > { %p470_p11 = por %p469_p10, %p468_p9 }
 0x112   : > { %p466_p8 = pneg %p465_p7 }
 0x113   : > { %p472_p13 = por %p471_p12, %p470_p11 }
 0x115   : > { %p473_p0 = pnand %p472_p13, %p466_p8 }
 0x117   : > { %476 = shalt.err (!%p473_p0)
}
 0x118   : > { %409 = dma.vmem_to_hbm [thread:$0]  (%p567_p5), %s685_s14, 128, %s683_s21, %s258_s22  }
 0x119 PF: > { %p415_p1 = scmp.ge.s32.totalorder %s511_s12, 2  ;;  %s283_s4 = sand.u32 1, %s499_s9  }
 0x11a   : > { %s284_s5 = scalar_lea.sflag [#allocation3], %s283_s4 }
 0x11b   : > { %p412_p2 = pnand %p415_p1, %p571_p6 }
 0x11d   : > { %494 = dma.done.wait (!%p412_p2), %s284_s5, 128  }
 0x11e   : > { %496 = vsyncadd (!%p412_p2), %s284_s5, 4294967168  ;;  %p12_p3 = scmp.ge.s32.totalorder %s554_s15, 4   ;;  %s730_s9 = smov %s503_s10 }
 0x11f   : > { %s731_s10 = smov %s507_s11  ;;  %s732_s11 = smov %s565_s18 }
 0x120   : > { %s733_s12 = smov %s554_s15  ;;  %14 = sbr.rel (!%p12_p3) target bundleno = 3 (0x3), region = 63 }
 0x127   :  { %289 = vsyncpa [#allocation3], 1 }
 0x128   :  { %291 = vsyncpa [#allocation3 + $0x1], 1 }

</bundles_post_ra>
